<compile_context>
chip_gen: v7x
topology: tpu7x:2x2x1
jax: 0.10.0
libtpu: 0.0.40
codegen_flags: <defaults>
</compile_context>

<pallas_src>
import functools

import numpy as np
import jax
import jax.numpy as jnp
from jax.experimental import pallas as pl
from jax.experimental.pallas import tpu as pltpu


# ---------------------------------------------------------------------------
# Pallas kernel
# ---------------------------------------------------------------------------
def _ste_fwd_kernel(x_ref, o_ref):
    # Elementwise binarization on the VPU at the input's native dtype:
    # (x > 0) -> 1, else 0 (NaN > 0 is False, matching PyTorch).
    o_ref[...] = (x_ref[...] > 0).astype(o_ref.dtype)


def _ste_forward_2d(x2d, block_rows, out_dtype):
    rows, cols = x2d.shape
    grid = (pl.cdiv(rows, block_rows),)
    return pl.pallas_call(
        _ste_fwd_kernel,
        out_shape=jax.ShapeDtypeStruct((rows, cols), out_dtype),
        grid=grid,
        in_specs=[pl.BlockSpec((block_rows, cols), lambda i: (i, 0))],
        out_specs=pl.BlockSpec((block_rows, cols), lambda i: (i, 0)),
        compiler_params=pltpu.CompilerParams(
            dimension_semantics=("parallel",),
            # ~24 MiB double-buffered residency; explicit limit also avoids the
            # 16 MiB scoped default on v5e.  Safe on v5e/v6e (128 MiB) and v7x (64 MiB).
            vmem_limit_bytes=40 * 1024 * 1024,
        ),
    )(x2d)


# ---------------------------------------------------------------------------
# Wrapper / layout plumbing
# ---------------------------------------------------------------------------
_SMALL_BYTES = 256 * 1024                 # below this, fusable XLA path wins
_BLOCK_BYTE_BUDGET = 12 * 1024 * 1024     # combined (in + out) bytes per grid step
_LANE_WIDTHS = (2048, 1024, 512, 256, 128)


@functools.cache
def _tensorcores_per_chip():
    """Best-effort TensorCores-per-chip query (v7x & megacore chips have 2)."""
    try:
        kind = jax.devices()[0].device_kind.lower()
    except Exception:
        return 1
    if any(tag in kind for tag in ("v4", "v5p", "v7", "7x")):
        return 2
    return 1


def _round_up(x, m):
    return ((x + m - 1) // m) * m


def _choose_cols(total):
    """Widest lane-dense width dividing `total` (caller guarantees 128 | total)."""
    for c in _LANE_WIDTHS:
        if total % c == 0:
            return c
    return 128


def _choose_block_rows(rows, cols, in_itemsize, out_itemsize):
    # Sublane packing multiple of the input dtype: f32 -> 8, bf16 -> 16, int8 -> 32.
    mult = 8 * max(1, 4 // in_itemsize)
    per_row_bytes = cols * (in_itemsize + out_itemsize)
    block_rows = max(mult, (_BLOCK_BYTE_BUDGET // per_row_bytes) // mult * mult)
    block_rows = min(block_rows, rows)
    # Only on 2-TensorCore chips: force >=2 grid steps so the "parallel" axis
    # shards across both cores (on 1-TC chips the grid is a serial loop and an
    # extra step is pure overhead on a mem-bound op).
    if (_tensorcores_per_chip() >= 2
            and pl.cdiv(rows, block_rows) < 2
            and rows >= 2 * mult):
        target_steps = 4 if rows >= 4 * mult else 2   # even step count -> balanced cores
        block_rows = max(mult, _round_up(pl.cdiv(rows, target_steps), mult))
    return block_rows


def _ste_apply(x, out_dtype=jnp.float32):
    total = x.size
    nbytes = total * x.dtype.itemsize

    # Tiny tensors and element counts not divisible by 128: the fusable XLA
    # elementwise path is at the HBM roofline and needs no pad/slice passes.
    if nbytes < _SMALL_BYTES or total % 128 != 0:
        return (x > 0).astype(out_dtype)

    orig_shape = x.shape
    cols = _choose_cols(total)
    rows = total // cols
    x2d = x.reshape(rows, cols)   # contiguous collapse: layout no-op

    block_rows = _choose_block_rows(
        rows, cols, x.dtype.itemsize, np.dtype(out_dtype).itemsize)
    y2d = _ste_forward_2d(x2d, block_rows, out_dtype)
    return y2d.reshape(orig_shape)


# ---------------------------------------------------------------------------
# custom_vjp: forward = binarize, backward = hardtanh(grad)
# ---------------------------------------------------------------------------
@jax.custom_vjp
def straight_through_estimator(x):
    """Forward: (x > 0) -> {0.0, 1.0} float32.  Backward: hardtanh(grad)."""
    return _ste_apply(x)


def _ste_vjp_fwd(x):
    # Residual: zero-size array carrying only the primal dtype so the backward
    # cotangent can be cast to match the input (fixes bf16/f16 inputs).
    return _ste_apply(x), jnp.zeros((0,), dtype=x.dtype)


def _ste_vjp_bwd(res, g):
    # STEFunction.backward: F.hardtanh(grad_output) == clip(grad, -1, 1),
    # cast back to the primal input's dtype.
    return (jnp.clip(g, -1.0, 1.0).astype(res.dtype),)


straight_through_estimator.defvjp(_ste_vjp_fwd, _ste_vjp_bwd)


# ---------------------------------------------------------------------------
# Demo / correctness checks
# ---------------------------------------------------------------------------
if __name__ == "__main__":
    key = jax.random.PRNGKey(0)
    k1, k2, k3, k4 = jax.random.split(key, 4)

    def check(x):
        y = jax.block_until_ready(straight_through_estimator(x))
        ref = (x > 0).astype(jnp.float32)
        assert y.shape == x.shape, (y.shape, x.shape)
        assert y.dtype == jnp.float32
        assert bool(jnp.all(y == ref))
        return y

    # 1) Small NCHW activation (XLA fallback path): (2, 4, 16, 16) f32, 8 KiB.
    x_small = jax.random.normal(k1, (2, 4, 16, 16), dtype=jnp.float32)
    check(x_small)

    # 2) f32 input large enough for the Pallas path (lane-dense, no pad): 512 KiB.
    x_f32 = jax.random.normal(k2, (4, 8, 64, 64), dtype=jnp.float32)
    check(x_f32)

    # 3) bf16 input on the Pallas path (native-dtype compare inside the kernel).
    x_bf16 = jax.random.normal(k2, (4, 8, 64, 64), dtype=jnp.bfloat16)
    check(x_bf16)

    # 4) Ragged element count (not a multiple of 128): XLA fallback, no extra passes.
    x_ragged = jax.random.normal(k3, (4, 3, 30, 30), dtype=jnp.float32)
    check(x_ragged)

    # 5) Backward: hardtanh(grad); cotangent dtype must match the bf16 primal.
    x_g = jax.random.normal(k4, (2, 4, 16, 16), dtype=jnp.bfloat16)
    gx = jax.block_until_ready(
        jax.grad(lambda v: straight_through_estimator(v).sum())(x_g))
    assert gx.dtype == x_g.dtype
    assert bool(jnp.all(gx == jnp.ones_like(x_g)))

    print("KERNEL_OK")
</pallas_src>

<mosaic_0001>
module attributes {stable_mosaic.version = 11 : i64} {
  func.func @_ste_fwd_kernel(%arg0: i32, %arg1: memref<64x2048xf32, #tpu.memory_space<vmem>>, %arg2: memref<64x2048xf32, #tpu.memory_space<vmem>>) attributes {dimension_semantics = [#tpu.dimension_semantics<parallel>], iteration_bounds = array<i64: 1>, scalar_prefetch = 0 : i64, scratch_operands = 0 : i64, tpu.core_type = #tpu.core_type<tc>, window_params = [{transform_indices = @transform_0, window_bounds = array<i64: 64, 2048>}, {transform_indices = @transform_1, window_bounds = array<i64: 64, 2048>}]} {
    %c0 = arith.constant 0 : index
    %c0_0 = arith.constant 0 : index
    %0 = vector.load %arg1[%c0, %c0_0] : memref<64x2048xf32, #tpu.memory_space<vmem>>, vector<64x2048xf32>
    %cst = arith.constant 0.000000e+00 : f32
    %1 = vector.broadcast %cst : f32 to vector<64x2048xf32>
    %2 = arith.cmpf ogt, %0, %1 : vector<64x2048xf32>
    %3 = arith.extui %2 : vector<64x2048xi1> to vector<64x2048xi32>
    %4 = arith.sitofp %3 : vector<64x2048xi32> to vector<64x2048xf32>
    %c0_1 = arith.constant 0 : index
    %c0_2 = arith.constant 0 : index
    %5 = vector.load %arg2[%c0_1, %c0_2] : memref<64x2048xf32, #tpu.memory_space<vmem>>, vector<64x2048xf32>
    tpu.vector_store %arg2[%c0_1, %c0_2], %4 {strides = array<i32>} : memref<64x2048xf32, #tpu.memory_space<vmem>>, vector<64x2048xf32>,
    return
  }
  func.func @transform_0(%arg0: i32) -> (i32, i32) {
    %c0_i32 = arith.constant 0 : i32
    %c0_i32_0 = arith.constant 0 : i32
    return %arg0, %c0_i32 : i32, i32
  }
  func.func @transform_1(%arg0: i32) -> (i32, i32) {
    %c0_i32 = arith.constant 0 : i32
    %c0_i32_0 = arith.constant 0 : i32
    return %arg0, %c0_i32 : i32, i32
  }
}

</mosaic_0001>

<bundles_post_ra>
// kernel: tpu_custom_call.1
= control target key start
LH: loop header
LB: loop body
LE: loop exit
PB: predicated region body
PF: predicated region fallthrough
CT: control target
= control target key end

     0   :  { %6 = vsyncpa [#allocation3], 0  ;;  %s1037_s0 = inlined_call_operand.hbm [shape: f32[64,2048], index: 0, kind: input, shape index: {}]   ;;  %s1038_s1 = inlined_call_operand.hbm [shape: f32[64,2048], index: 1, kind: output, shape index: {}]  }
   0x1   :  { %7 = vsyncpa [#allocation4], 0  ;;  %s861_s6 = smov [#allocation2]   ;;  %s813_s10 = scalar_lea.hbm %s1037_s0, 16384 }
   0x2   :  { %s13_s7 = sshll.u32 %s861_s6, 4  ;;  %p814_p0 = scmp.ne.s32.totalorder %s1037_s0, %s813_s10  ;;  %s14_s7 = int_to_ptr.vmem [resolvable:$true] %s13_s7 }
   0x3   :  { %p817_p1 = scmp.lt.u32.totalorder %s813_s10, %s1037_s0 }
   0x5   :  { %p819_p2 = pnand %p817_p1, %p814_p0 }
   0x7   :  { %822 = shalt.err (!%p819_p2)
}
   0x8   :  { %s823_s15 = scalar_lea.vmem %s14_s7, 16384  ;;  %p828_p4 = scmp.lt.s32.totalorder %s14_s7, %s14_s7 }
   0x9   :  { %p824_p3 = scmp.ne.s32.totalorder %s14_s7, %s823_s15  ;;  %p829_p5 = scmp.lt.s32.totalorder %s823_s15, %s823_s15 }
   0xb   :  { %p830_p6 = por %p829_p5, %p828_p4 }
   0xd   :  { %p831_p7 = pnand %p830_p6, %p824_p3 }
   0xf   :  { %834 = shalt.err (!%p831_p7)
}
  0x10   :  { %s862_s16 = smov 2048   ;;  %s863_s17 = smov 128  }
  0x11   :  { %19 = dma.hbm_to_vmem [thread:$0]  %s1037_s0, 16384, %s14_s7, [#allocation3], %s862_s16, %s862_s16, %s863_s17  }
  0x12   :  { %857 = dma.done.wait [#allocation3], 16384  }
  0x13   :  { %858 = vsyncadd [#allocation3], 4294950912  ;;  %v23_v0 = vld [vmem:[#allocation2] sm:$0xff]  ;;  %v24_v1 = vld [vmem:[#allocation2 + $0x8] sm:$0xff]  ;;  %s864_s20 = smov [#allocation5]   ;;  %v865_v6 = vmov 0.0  }
  0x14   :  { %v25_v2 = vld [vmem:[#allocation2 + $0x10] sm:$0xff]  ;;  %s891_s21 = sshll.u32 %s864_s20, 4  ;;  %vm151_vm0 = vcmp.gt.f32.partialorder %v23_v0, 0.0  ;;  %vm152_vm1 = vcmp.gt.f32.partialorder %v24_v1, 0.0  ;;  %v26_v3 = vld [vmem:[#allocation2 + $0x18] sm:$0xff]  ;;  %v27_v4 = vld [vmem:[#allocation2 + $0x20] sm:$0xff]  ;;  %s669_s21 = int_to_ptr.vmem [resolvable:$true] %s891_s21 }
  0x15   :  { %vm153_vm2 = vcmp.gt.f32.partialorder %v25_v2, 0.0  ;;  %v28_v5 = vld [vmem:[#allocation2 + $0x28] sm:$0xff]  ;;  %v680_v7 = vsel %vm151_vm0, 1.0, %v865_v6  ;;  %v681_v8 = vsel %vm152_vm1, 1.0, %v865_v6  ;;  %vm154_vm3 = vcmp.gt.f32.partialorder %v26_v3, 0.0  ;;  %v29_v10 = vld [vmem:[#allocation2 + $0x30] sm:$0xff]  ;;  %p840_p9 = scmp.lt.s32.totalorder %s669_s21, %s669_s21 }
  0x16   :  { %v682_v9 = vsel %vm153_vm2, 1.0, %v865_v6  ;;  %v30_v11 = vld [vmem:[#allocation2 + $0x38] sm:$0xff]  ;;  %535 = vst [vmem:[#allocation5] sm:$0xff] %v680_v7  ;;  %536 = vst [vmem:[#allocation5 + $0x8] sm:$0xff] %v681_v8  ;;  %v683_v12 = vsel %vm154_vm3, 1.0, %v865_v6  ;;  %vm155_vm4 = vcmp.gt.f32.partialorder %v27_v4, 0.0 }
  0x17   :  { %537 = vst [vmem:[#allocation5 + $0x10] sm:$0xff] %v682_v9  ;;  %vm156_vm5 = vcmp.gt.f32.partialorder %v28_v5, 0.0  ;;  %vm157_vm6 = vcmp.gt.f32.partialorder %v29_v10, 0.0  ;;  %v31_v13 = vld [vmem:[#allocation2 + $0x40] sm:$0xff]  ;;  %v32_v14 = vld [vmem:[#allocation2 + $0x48] sm:$0xff]  ;;  %538 = vst [vmem:[#allocation5 + $0x18] sm:$0xff] %v683_v12 }
  0x18   :  { %v684_v15 = vsel %vm155_vm4, 1.0, %v865_v6  ;;  %v685_v16 = vsel %vm156_vm5, 1.0, %v865_v6  ;;  %v686_v17 = vsel %vm157_vm6, 1.0, %v865_v6  ;;  %vm158_vm7 = vcmp.gt.f32.partialorder %v30_v11, 0.0  ;;  %v33_v18 = vld [vmem:[#allocation2 + $0x50] sm:$0xff]  ;;  %v34_v19 = vld [vmem:[#allocation2 + $0x58] sm:$0xff] }
  0x19   :  { %539 = vst [vmem:[#allocation5 + $0x20] sm:$0xff] %v684_v15  ;;  %540 = vst [vmem:[#allocation5 + $0x28] sm:$0xff] %v685_v16  ;;  %v687_v20 = vsel %vm158_vm7, 1.0, %v865_v6  ;;  %vm159_vm8 = vcmp.gt.f32.partialorder %v31_v13, 0.0  ;;  %vm160_vm9 = vcmp.gt.f32.partialorder %v32_v14, 0.0  ;;  %vm161_vm10 = vcmp.gt.f32.partialorder %v33_v18, 0.0 }
  0x1a   :  { %541 = vst [vmem:[#allocation5 + $0x30] sm:$0xff] %v686_v17  ;;  %v35_v21 = vld [vmem:[#allocation2 + $0x60] sm:$0xff]  ;;  %v36_v22 = vld [vmem:[#allocation2 + $0x68] sm:$0xff]  ;;  %542 = vst [vmem:[#allocation5 + $0x38] sm:$0xff] %v687_v20  ;;  %v688_v23 = vsel %vm159_vm8, 1.0, %v865_v6  ;;  %v689_v24 = vsel %vm160_vm9, 1.0, %v865_v6 }
  0x1b   :  { %v690_v25 = vsel %vm161_vm10, 1.0, %v865_v6  ;;  %vm162_vm11 = vcmp.gt.f32.partialorder %v34_v19, 0.0  ;;  %v37_v26 = vld [vmem:[#allocation2 + $0x70] sm:$0xff]  ;;  %v38_v27 = vld [vmem:[#allocation2 + $0x78] sm:$0xff]  ;;  %543 = vst [vmem:[#allocation5 + $0x40] sm:$0xff] %v688_v23  ;;  %544 = vst [vmem:[#allocation5 + $0x48] sm:$0xff] %v689_v24 }
  0x1c   :  { %545 = vst [vmem:[#allocation5 + $0x50] sm:$0xff] %v690_v25  ;;  %v691_v28 = vsel %vm162_vm11, 1.0, %v865_v6  ;;  %vm163_vm12 = vcmp.gt.f32.partialorder %v35_v21, 0.0  ;;  %vm164_vm13 = vcmp.gt.f32.partialorder %v36_v22, 0.0  ;;  %vm165_vm14 = vcmp.gt.f32.partialorder %v37_v26, 0.0  ;;  %v39_v29 = vld [vmem:[#allocation2 + $0x80] sm:$0xff] }
  0x1d   :  { %v40_v30 = vld [vmem:[#allocation2 + $0x88] sm:$0xff]  ;;  %546 = vst [vmem:[#allocation5 + $0x58] sm:$0xff] %v691_v28  ;;  %v692_v31 = vsel %vm163_vm12, 1.0, %v865_v6  ;;  %v693_v32 = vsel %vm164_vm13, 1.0, %v865_v6  ;;  %v694_v33 = vsel %vm165_vm14, 1.0, %v865_v6  ;;  %vm166_vm15 = vcmp.gt.f32.partialorder %v38_v27, 0.0 }
  0x1e   :  { %v41_v34 = vld [vmem:[#allocation2 + $0x90] sm:$0xff]  ;;  %v42_v35 = vld [vmem:[#allocation2 + $0x98] sm:$0xff]  ;;  %547 = vst [vmem:[#allocation5 + $0x60] sm:$0xff] %v692_v31  ;;  %548 = vst [vmem:[#allocation5 + $0x68] sm:$0xff] %v693_v32  ;;  %v695_v36 = vsel %vm166_vm15, 1.0, %v865_v6  ;;  %vm167_vm0 = vcmp.gt.f32.partialorder %v39_v29, 0.0 }
  0x1f   :  { %549 = vst [vmem:[#allocation5 + $0x70] sm:$0xff] %v694_v33  ;;  %vm168_vm1 = vcmp.gt.f32.partialorder %v40_v30, 0.0  ;;  %vm169_vm2 = vcmp.gt.f32.partialorder %v41_v34, 0.0  ;;  %v43_v37 = vld [vmem:[#allocation2 + $0xa0] sm:$0xff]  ;;  %v44_v38 = vld [vmem:[#allocation2 + $0xa8] sm:$0xff]  ;;  %550 = vst [vmem:[#allocation5 + $0x78] sm:$0xff] %v695_v36 }
  0x20   :  { %v696_v39 = vsel %vm167_vm0, 1.0, %v865_v6  ;;  %v697_v40 = vsel %vm168_vm1, 1.0, %v865_v6  ;;  %v698_v41 = vsel %vm169_vm2, 1.0, %v865_v6  ;;  %vm170_vm3 = vcmp.gt.f32.partialorder %v42_v35, 0.0  ;;  %v45_v42 = vld [vmem:[#allocation2 + $0xb0] sm:$0xff]  ;;  %v46_v43 = vld [vmem:[#allocation2 + $0xb8] sm:$0xff] }
  0x21   :  { %551 = vst [vmem:[#allocation5 + $0x80] sm:$0xff] %v696_v39  ;;  %552 = vst [vmem:[#allocation5 + $0x88] sm:$0xff] %v697_v40  ;;  %v699_v44 = vsel %vm170_vm3, 1.0, %v865_v6  ;;  %vm171_vm4 = vcmp.gt.f32.partialorder %v43_v37, 0.0  ;;  %vm172_vm5 = vcmp.gt.f32.partialorder %v44_v38, 0.0  ;;  %vm173_vm6 = vcmp.gt.f32.partialorder %v45_v42, 0.0 }
  0x22   :  { %553 = vst [vmem:[#allocation5 + $0x90] sm:$0xff] %v698_v41  ;;  %v47_v45 = vld [vmem:[#allocation2 + $0xc0] sm:$0xff]  ;;  %v48_v46 = vld [vmem:[#allocation2 + $0xc8] sm:$0xff]  ;;  %554 = vst [vmem:[#allocation5 + $0x98] sm:$0xff] %v699_v44  ;;  %v700_v47 = vsel %vm171_vm4, 1.0, %v865_v6  ;;  %v701_v48 = vsel %vm172_vm5, 1.0, %v865_v6 }
  0x23   :  { %v702_v49 = vsel %vm173_vm6, 1.0, %v865_v6  ;;  %vm174_vm7 = vcmp.gt.f32.partialorder %v46_v43, 0.0  ;;  %v49_v50 = vld [vmem:[#allocation2 + $0xd0] sm:$0xff]  ;;  %v50_v51 = vld [vmem:[#allocation2 + $0xd8] sm:$0xff]  ;;  %555 = vst [vmem:[#allocation5 + $0xa0] sm:$0xff] %v700_v47  ;;  %556 = vst [vmem:[#allocation5 + $0xa8] sm:$0xff] %v701_v48 }
  0x24   :  { %557 = vst [vmem:[#allocation5 + $0xb0] sm:$0xff] %v702_v49  ;;  %v703_v52 = vsel %vm174_vm7, 1.0, %v865_v6  ;;  %vm175_vm8 = vcmp.gt.f32.partialorder %v47_v45, 0.0  ;;  %vm176_vm9 = vcmp.gt.f32.partialorder %v48_v46, 0.0  ;;  %vm177_vm10 = vcmp.gt.f32.partialorder %v49_v50, 0.0  ;;  %v51_v53 = vld [vmem:[#allocation2 + $0xe0] sm:$0xff] }
  0x25   :  { %v52_v54 = vld [vmem:[#allocation2 + $0xe8] sm:$0xff]  ;;  %558 = vst [vmem:[#allocation5 + $0xb8] sm:$0xff] %v703_v52  ;;  %v704_v55 = vsel %vm175_vm8, 1.0, %v865_v6  ;;  %v705_v56 = vsel %vm176_vm9, 1.0, %v865_v6  ;;  %v706_v57 = vsel %vm177_vm10, 1.0, %v865_v6  ;;  %vm178_vm11 = vcmp.gt.f32.partialorder %v50_v51, 0.0 }
  0x26   :  { %v53_v58 = vld [vmem:[#allocation2 + $0xf0] sm:$0xff]  ;;  %v54_v59 = vld [vmem:[#allocation2 + $0xf8] sm:$0xff]  ;;  %559 = vst [vmem:[#allocation5 + $0xc0] sm:$0xff] %v704_v55  ;;  %560 = vst [vmem:[#allocation5 + $0xc8] sm:$0xff] %v705_v56  ;;  %v707_v60 = vsel %vm178_vm11, 1.0, %v865_v6  ;;  %vm179_vm12 = vcmp.gt.f32.partialorder %v51_v53, 0.0 }
  0x27   :  { %561 = vst [vmem:[#allocation5 + $0xd0] sm:$0xff] %v706_v57  ;;  %vm180_vm13 = vcmp.gt.f32.partialorder %v52_v54, 0.0  ;;  %vm181_vm14 = vcmp.gt.f32.partialorder %v53_v58, 0.0  ;;  %v55_v61 = vld [vmem:[#allocation2 + $0x100] sm:$0xff]  ;;  %v56_v62 = vld [vmem:[#allocation2 + $0x108] sm:$0xff]  ;;  %562 = vst [vmem:[#allocation5 + $0xd8] sm:$0xff] %v707_v60 }
  0x28   :  { %v708_v63 = vsel %vm179_vm12, 1.0, %v865_v6  ;;  %v709_v0 = vsel %vm180_vm13, 1.0, %v865_v6  ;;  %v710_v1 = vsel %vm181_vm14, 1.0, %v865_v6  ;;  %vm182_vm15 = vcmp.gt.f32.partialorder %v54_v59, 0.0  ;;  %v57_v2 = vld [vmem:[#allocation2 + $0x110] sm:$0xff]  ;;  %v58_v3 = vld [vmem:[#allocation2 + $0x118] sm:$0xff] }
  0x29   :  { %563 = vst [vmem:[#allocation5 + $0xe0] sm:$0xff] %v708_v63  ;;  %564 = vst [vmem:[#allocation5 + $0xe8] sm:$0xff] %v709_v0  ;;  %v711_v4 = vsel %vm182_vm15, 1.0, %v865_v6  ;;  %vm183_vm0 = vcmp.gt.f32.partialorder %v55_v61, 0.0  ;;  %vm184_vm1 = vcmp.gt.f32.partialorder %v56_v62, 0.0  ;;  %vm185_vm2 = vcmp.gt.f32.partialorder %v57_v2, 0.0 }
  0x2a   :  { %565 = vst [vmem:[#allocation5 + $0xf0] sm:$0xff] %v710_v1  ;;  %v59_v5 = vld [vmem:[#allocation2 + $0x120] sm:$0xff]  ;;  %v60_v7 = vld [vmem:[#allocation2 + $0x128] sm:$0xff]  ;;  %566 = vst [vmem:[#allocation5 + $0xf8] sm:$0xff] %v711_v4  ;;  %v712_v8 = vsel %vm183_vm0, 1.0, %v865_v6  ;;  %v713_v9 = vsel %vm184_vm1, 1.0, %v865_v6 }
  0x2b   :  { %v714_v10 = vsel %vm185_vm2, 1.0, %v865_v6  ;;  %vm186_vm3 = vcmp.gt.f32.partialorder %v58_v3, 0.0  ;;  %v61_v11 = vld [vmem:[#allocation2 + $0x130] sm:$0xff]  ;;  %v62_v12 = vld [vmem:[#allocation2 + $0x138] sm:$0xff]  ;;  %567 = vst [vmem:[#allocation5 + $0x100] sm:$0xff] %v712_v8  ;;  %568 = vst [vmem:[#allocation5 + $0x108] sm:$0xff] %v713_v9 }
  0x2c   :  { %569 = vst [vmem:[#allocation5 + $0x110] sm:$0xff] %v714_v10  ;;  %v715_v13 = vsel %vm186_vm3, 1.0, %v865_v6  ;;  %vm187_vm4 = vcmp.gt.f32.partialorder %v59_v5, 0.0  ;;  %vm188_vm5 = vcmp.gt.f32.partialorder %v60_v7, 0.0  ;;  %vm189_vm6 = vcmp.gt.f32.partialorder %v61_v11, 0.0  ;;  %v63_v14 = vld [vmem:[#allocation2 + $0x140] sm:$0xff] }
  0x2d   :  { %v64_v15 = vld [vmem:[#allocation2 + $0x148] sm:$0xff]  ;;  %570 = vst [vmem:[#allocation5 + $0x118] sm:$0xff] %v715_v13  ;;  %v716_v16 = vsel %vm187_vm4, 1.0, %v865_v6  ;;  %v717_v17 = vsel %vm188_vm5, 1.0, %v865_v6  ;;  %v718_v18 = vsel %vm189_vm6, 1.0, %v865_v6  ;;  %vm190_vm7 = vcmp.gt.f32.partialorder %v62_v12, 0.0 }
  0x2e   :  { %v65_v19 = vld [vmem:[#allocation2 + $0x150] sm:$0xff]  ;;  %v66_v20 = vld [vmem:[#allocation2 + $0x158] sm:$0xff]  ;;  %571 = vst [vmem:[#allocation5 + $0x120] sm:$0xff] %v716_v16  ;;  %572 = vst [vmem:[#allocation5 + $0x128] sm:$0xff] %v717_v17  ;;  %v719_v21 = vsel %vm190_vm7, 1.0, %v865_v6  ;;  %vm191_vm8 = vcmp.gt.f32.partialorder %v63_v14, 0.0 }
  0x2f   :  { %573 = vst [vmem:[#allocation5 + $0x130] sm:$0xff] %v718_v18  ;;  %vm192_vm9 = vcmp.gt.f32.partialorder %v64_v15, 0.0  ;;  %vm193_vm10 = vcmp.gt.f32.partialorder %v65_v19, 0.0  ;;  %v67_v22 = vld [vmem:[#allocation2 + $0x160] sm:$0xff]  ;;  %v68_v23 = vld [vmem:[#allocation2 + $0x168] sm:$0xff]  ;;  %574 = vst [vmem:[#allocation5 + $0x138] sm:$0xff] %v719_v21 }
  0x30   :  { %v720_v24 = vsel %vm191_vm8, 1.0, %v865_v6  ;;  %v721_v25 = vsel %vm192_vm9, 1.0, %v865_v6  ;;  %v722_v26 = vsel %vm193_vm10, 1.0, %v865_v6  ;;  %vm194_vm11 = vcmp.gt.f32.partialorder %v66_v20, 0.0  ;;  %v69_v27 = vld [vmem:[#allocation2 + $0x170] sm:$0xff]  ;;  %v70_v28 = vld [vmem:[#allocation2 + $0x178] sm:$0xff] }
  0x31   :  { %575 = vst [vmem:[#allocation5 + $0x140] sm:$0xff] %v720_v24  ;;  %576 = vst [vmem:[#allocation5 + $0x148] sm:$0xff] %v721_v25  ;;  %v723_v29 = vsel %vm194_vm11, 1.0, %v865_v6  ;;  %vm195_vm12 = vcmp.gt.f32.partialorder %v67_v22, 0.0  ;;  %vm196_vm13 = vcmp.gt.f32.partialorder %v68_v23, 0.0  ;;  %vm197_vm14 = vcmp.gt.f32.partialorder %v69_v27, 0.0 }
  0x32   :  { %577 = vst [vmem:[#allocation5 + $0x150] sm:$0xff] %v722_v26  ;;  %v71_v30 = vld [vmem:[#allocation2 + $0x180] sm:$0xff]  ;;  %v72_v31 = vld [vmem:[#allocation2 + $0x188] sm:$0xff]  ;;  %578 = vst [vmem:[#allocation5 + $0x158] sm:$0xff] %v723_v29  ;;  %v724_v32 = vsel %vm195_vm12, 1.0, %v865_v6  ;;  %v725_v33 = vsel %vm196_vm13, 1.0, %v865_v6 }
  0x33   :  { %v726_v34 = vsel %vm197_vm14, 1.0, %v865_v6  ;;  %vm198_vm15 = vcmp.gt.f32.partialorder %v70_v28, 0.0  ;;  %v73_v35 = vld [vmem:[#allocation2 + $0x190] sm:$0xff]  ;;  %v74_v36 = vld [vmem:[#allocation2 + $0x198] sm:$0xff]  ;;  %579 = vst [vmem:[#allocation5 + $0x160] sm:$0xff] %v724_v32  ;;  %580 = vst [vmem:[#allocation5 + $0x168] sm:$0xff] %v725_v33 }
  0x34   :  { %581 = vst [vmem:[#allocation5 + $0x170] sm:$0xff] %v726_v34  ;;  %v727_v37 = vsel %vm198_vm15, 1.0, %v865_v6  ;;  %vm199_vm0 = vcmp.gt.f32.partialorder %v71_v30, 0.0  ;;  %vm200_vm1 = vcmp.gt.f32.partialorder %v72_v31, 0.0  ;;  %vm201_vm2 = vcmp.gt.f32.partialorder %v73_v35, 0.0  ;;  %v75_v38 = vld [vmem:[#allocation2 + $0x1a0] sm:$0xff] }
  0x35   :  { %v76_v39 = vld [vmem:[#allocation2 + $0x1a8] sm:$0xff]  ;;  %582 = vst [vmem:[#allocation5 + $0x178] sm:$0xff] %v727_v37  ;;  %v728_v40 = vsel %vm199_vm0, 1.0, %v865_v6  ;;  %v729_v41 = vsel %vm200_vm1, 1.0, %v865_v6  ;;  %v730_v42 = vsel %vm201_vm2, 1.0, %v865_v6  ;;  %vm202_vm3 = vcmp.gt.f32.partialorder %v74_v36, 0.0 }
  0x36   :  { %v77_v43 = vld [vmem:[#allocation2 + $0x1b0] sm:$0xff]  ;;  %v78_v44 = vld [vmem:[#allocation2 + $0x1b8] sm:$0xff]  ;;  %583 = vst [vmem:[#allocation5 + $0x180] sm:$0xff] %v728_v40  ;;  %584 = vst [vmem:[#allocation5 + $0x188] sm:$0xff] %v729_v41  ;;  %v731_v45 = vsel %vm202_vm3, 1.0, %v865_v6  ;;  %vm203_vm4 = vcmp.gt.f32.partialorder %v75_v38, 0.0 }
  0x37   :  { %585 = vst [vmem:[#allocation5 + $0x190] sm:$0xff] %v730_v42  ;;  %vm204_vm5 = vcmp.gt.f32.partialorder %v76_v39, 0.0  ;;  %vm205_vm6 = vcmp.gt.f32.partialorder %v77_v43, 0.0  ;;  %v79_v46 = vld [vmem:[#allocation2 + $0x1c0] sm:$0xff]  ;;  %v80_v47 = vld [vmem:[#allocation2 + $0x1c8] sm:$0xff]  ;;  %586 = vst [vmem:[#allocation5 + $0x198] sm:$0xff] %v731_v45 }
  0x38   :  { %v732_v48 = vsel %vm203_vm4, 1.0, %v865_v6  ;;  %v733_v49 = vsel %vm204_vm5, 1.0, %v865_v6  ;;  %v734_v50 = vsel %vm205_vm6, 1.0, %v865_v6  ;;  %vm206_vm7 = vcmp.gt.f32.partialorder %v78_v44, 0.0  ;;  %v81_v51 = vld [vmem:[#allocation2 + $0x1d0] sm:$0xff]  ;;  %v82_v52 = vld [vmem:[#allocation2 + $0x1d8] sm:$0xff] }
  0x39   :  { %587 = vst [vmem:[#allocation5 + $0x1a0] sm:$0xff] %v732_v48  ;;  %588 = vst [vmem:[#allocation5 + $0x1a8] sm:$0xff] %v733_v49  ;;  %v735_v53 = vsel %vm206_vm7, 1.0, %v865_v6  ;;  %vm207_vm8 = vcmp.gt.f32.partialorder %v79_v46, 0.0  ;;  %vm208_vm9 = vcmp.gt.f32.partialorder %v80_v47, 0.0  ;;  %vm209_vm10 = vcmp.gt.f32.partialorder %v81_v51, 0.0 }
  0x3a   :  { %589 = vst [vmem:[#allocation5 + $0x1b0] sm:$0xff] %v734_v50  ;;  %v83_v54 = vld [vmem:[#allocation2 + $0x1e0] sm:$0xff]  ;;  %v84_v55 = vld [vmem:[#allocation2 + $0x1e8] sm:$0xff]  ;;  %590 = vst [vmem:[#allocation5 + $0x1b8] sm:$0xff] %v735_v53  ;;  %v736_v56 = vsel %vm207_vm8, 1.0, %v865_v6  ;;  %v737_v57 = vsel %vm208_vm9, 1.0, %v865_v6 }
  0x3b   :  { %v738_v58 = vsel %vm209_vm10, 1.0, %v865_v6  ;;  %vm210_vm11 = vcmp.gt.f32.partialorder %v82_v52, 0.0  ;;  %v85_v59 = vld [vmem:[#allocation2 + $0x1f0] sm:$0xff]  ;;  %v86_v60 = vld [vmem:[#allocation2 + $0x1f8] sm:$0xff]  ;;  %591 = vst [vmem:[#allocation5 + $0x1c0] sm:$0xff] %v736_v56  ;;  %592 = vst [vmem:[#allocation5 + $0x1c8] sm:$0xff] %v737_v57 }
  0x3c   :  { %593 = vst [vmem:[#allocation5 + $0x1d0] sm:$0xff] %v738_v58  ;;  %v739_v61 = vsel %vm210_vm11, 1.0, %v865_v6  ;;  %vm211_vm12 = vcmp.gt.f32.partialorder %v83_v54, 0.0  ;;  %vm212_vm13 = vcmp.gt.f32.partialorder %v84_v55, 0.0  ;;  %vm213_vm14 = vcmp.gt.f32.partialorder %v85_v59, 0.0  ;;  %v87_v62 = vld [vmem:[#allocation2 + $0x200] sm:$0xff] }
  0x3d   :  { %v88_v63 = vld [vmem:[#allocation2 + $0x208] sm:$0xff]  ;;  %594 = vst [vmem:[#allocation5 + $0x1d8] sm:$0xff] %v739_v61  ;;  %v740_v0 = vsel %vm211_vm12, 1.0, %v865_v6  ;;  %v741_v1 = vsel %vm212_vm13, 1.0, %v865_v6  ;;  %v742_v2 = vsel %vm213_vm14, 1.0, %v865_v6  ;;  %vm214_vm15 = vcmp.gt.f32.partialorder %v86_v60, 0.0 }
  0x3e   :  { %v89_v3 = vld [vmem:[#allocation2 + $0x210] sm:$0xff]  ;;  %v90_v4 = vld [vmem:[#allocation2 + $0x218] sm:$0xff]  ;;  %595 = vst [vmem:[#allocation5 + $0x1e0] sm:$0xff] %v740_v0  ;;  %596 = vst [vmem:[#allocation5 + $0x1e8] sm:$0xff] %v741_v1  ;;  %v743_v5 = vsel %vm214_vm15, 1.0, %v865_v6  ;;  %vm215_vm0 = vcmp.gt.f32.partialorder %v87_v62, 0.0 }
  0x3f   :  { %597 = vst [vmem:[#allocation5 + $0x1f0] sm:$0xff] %v742_v2  ;;  %vm216_vm1 = vcmp.gt.f32.partialorder %v88_v63, 0.0  ;;  %vm217_vm2 = vcmp.gt.f32.partialorder %v89_v3, 0.0  ;;  %v91_v7 = vld [vmem:[#allocation2 + $0x220] sm:$0xff]  ;;  %v92_v8 = vld [vmem:[#allocation2 + $0x228] sm:$0xff]  ;;  %598 = vst [vmem:[#allocation5 + $0x1f8] sm:$0xff] %v743_v5 }
  0x40   :  { %v744_v9 = vsel %vm215_vm0, 1.0, %v865_v6  ;;  %v745_v10 = vsel %vm216_vm1, 1.0, %v865_v6  ;;  %v746_v11 = vsel %vm217_vm2, 1.0, %v865_v6  ;;  %vm218_vm3 = vcmp.gt.f32.partialorder %v90_v4, 0.0  ;;  %v93_v12 = vld [vmem:[#allocation2 + $0x230] sm:$0xff]  ;;  %v94_v13 = vld [vmem:[#allocation2 + $0x238] sm:$0xff] }
  0x41   :  { %599 = vst [vmem:[#allocation5 + $0x200] sm:$0xff] %v744_v9  ;;  %600 = vst [vmem:[#allocation5 + $0x208] sm:$0xff] %v745_v10  ;;  %v747_v14 = vsel %vm218_vm3, 1.0, %v865_v6  ;;  %vm219_vm4 = vcmp.gt.f32.partialorder %v91_v7, 0.0  ;;  %vm220_vm5 = vcmp.gt.f32.partialorder %v92_v8, 0.0  ;;  %vm221_vm6 = vcmp.gt.f32.partialorder %v93_v12, 0.0 }
  0x42   :  { %601 = vst [vmem:[#allocation5 + $0x210] sm:$0xff] %v746_v11  ;;  %v95_v15 = vld [vmem:[#allocation2 + $0x240] sm:$0xff]  ;;  %v96_v16 = vld [vmem:[#allocation2 + $0x248] sm:$0xff]  ;;  %602 = vst [vmem:[#allocation5 + $0x218] sm:$0xff] %v747_v14  ;;  %v748_v17 = vsel %vm219_vm4, 1.0, %v865_v6  ;;  %v749_v18 = vsel %vm220_vm5, 1.0, %v865_v6 }
  0x43   :  { %v750_v19 = vsel %vm221_vm6, 1.0, %v865_v6  ;;  %vm222_vm7 = vcmp.gt.f32.partialorder %v94_v13, 0.0  ;;  %v97_v20 = vld [vmem:[#allocation2 + $0x250] sm:$0xff]  ;;  %v98_v21 = vld [vmem:[#allocation2 + $0x258] sm:$0xff]  ;;  %603 = vst [vmem:[#allocation5 + $0x220] sm:$0xff] %v748_v17  ;;  %604 = vst [vmem:[#allocation5 + $0x228] sm:$0xff] %v749_v18 }
  0x44   :  { %605 = vst [vmem:[#allocation5 + $0x230] sm:$0xff] %v750_v19  ;;  %v751_v22 = vsel %vm222_vm7, 1.0, %v865_v6  ;;  %vm223_vm8 = vcmp.gt.f32.partialorder %v95_v15, 0.0  ;;  %vm224_vm9 = vcmp.gt.f32.partialorder %v96_v16, 0.0  ;;  %vm225_vm10 = vcmp.gt.f32.partialorder %v97_v20, 0.0  ;;  %v99_v23 = vld [vmem:[#allocation2 + $0x260] sm:$0xff] }
  0x45   :  { %v100_v24 = vld [vmem:[#allocation2 + $0x268] sm:$0xff]  ;;  %606 = vst [vmem:[#allocation5 + $0x238] sm:$0xff] %v751_v22  ;;  %v752_v25 = vsel %vm223_vm8, 1.0, %v865_v6  ;;  %v753_v26 = vsel %vm224_vm9, 1.0, %v865_v6  ;;  %v754_v27 = vsel %vm225_vm10, 1.0, %v865_v6  ;;  %vm226_vm11 = vcmp.gt.f32.partialorder %v98_v21, 0.0 }
  0x46   :  { %v101_v28 = vld [vmem:[#allocation2 + $0x270] sm:$0xff]  ;;  %v102_v29 = vld [vmem:[#allocation2 + $0x278] sm:$0xff]  ;;  %607 = vst [vmem:[#allocation5 + $0x240] sm:$0xff] %v752_v25  ;;  %608 = vst [vmem:[#allocation5 + $0x248] sm:$0xff] %v753_v26  ;;  %v755_v30 = vsel %vm226_vm11, 1.0, %v865_v6  ;;  %vm227_vm12 = vcmp.gt.f32.partialorder %v99_v23, 0.0 }
  0x47   :  { %609 = vst [vmem:[#allocation5 + $0x250] sm:$0xff] %v754_v27  ;;  %vm228_vm13 = vcmp.gt.f32.partialorder %v100_v24, 0.0  ;;  %vm229_vm14 = vcmp.gt.f32.partialorder %v101_v28, 0.0  ;;  %v103_v31 = vld [vmem:[#allocation2 + $0x280] sm:$0xff]  ;;  %v104_v32 = vld [vmem:[#allocation2 + $0x288] sm:$0xff]  ;;  %610 = vst [vmem:[#allocation5 + $0x258] sm:$0xff] %v755_v30 }
  0x48   :  { %v756_v33 = vsel %vm227_vm12, 1.0, %v865_v6  ;;  %v757_v34 = vsel %vm228_vm13, 1.0, %v865_v6  ;;  %v758_v35 = vsel %vm229_vm14, 1.0, %v865_v6  ;;  %vm230_vm15 = vcmp.gt.f32.partialorder %v102_v29, 0.0  ;;  %v105_v36 = vld [vmem:[#allocation2 + $0x290] sm:$0xff]  ;;  %v106_v37 = vld [vmem:[#allocation2 + $0x298] sm:$0xff] }
  0x49   :  { %611 = vst [vmem:[#allocation5 + $0x260] sm:$0xff] %v756_v33  ;;  %612 = vst [vmem:[#allocation5 + $0x268] sm:$0xff] %v757_v34  ;;  %v759_v38 = vsel %vm230_vm15, 1.0, %v865_v6  ;;  %vm231_vm0 = vcmp.gt.f32.partialorder %v103_v31, 0.0  ;;  %vm232_vm1 = vcmp.gt.f32.partialorder %v104_v32, 0.0  ;;  %vm233_vm2 = vcmp.gt.f32.partialorder %v105_v36, 0.0 }
  0x4a   :  { %613 = vst [vmem:[#allocation5 + $0x270] sm:$0xff] %v758_v35  ;;  %v107_v39 = vld [vmem:[#allocation2 + $0x2a0] sm:$0xff]  ;;  %v108_v40 = vld [vmem:[#allocation2 + $0x2a8] sm:$0xff]  ;;  %614 = vst [vmem:[#allocation5 + $0x278] sm:$0xff] %v759_v38  ;;  %v760_v41 = vsel %vm231_vm0, 1.0, %v865_v6  ;;  %v761_v42 = vsel %vm232_vm1, 1.0, %v865_v6 }
  0x4b   :  { %v762_v43 = vsel %vm233_vm2, 1.0, %v865_v6  ;;  %vm234_vm3 = vcmp.gt.f32.partialorder %v106_v37, 0.0  ;;  %v109_v44 = vld [vmem:[#allocation2 + $0x2b0] sm:$0xff]  ;;  %v110_v45 = vld [vmem:[#allocation2 + $0x2b8] sm:$0xff]  ;;  %615 = vst [vmem:[#allocation5 + $0x280] sm:$0xff] %v760_v41  ;;  %616 = vst [vmem:[#allocation5 + $0x288] sm:$0xff] %v761_v42 }
  0x4c   :  { %617 = vst [vmem:[#allocation5 + $0x290] sm:$0xff] %v762_v43  ;;  %v763_v46 = vsel %vm234_vm3, 1.0, %v865_v6  ;;  %vm235_vm4 = vcmp.gt.f32.partialorder %v107_v39, 0.0  ;;  %vm236_vm5 = vcmp.gt.f32.partialorder %v108_v40, 0.0  ;;  %vm237_vm6 = vcmp.gt.f32.partialorder %v109_v44, 0.0  ;;  %v111_v47 = vld [vmem:[#allocation2 + $0x2c0] sm:$0xff] }
  0x4d   :  { %v112_v48 = vld [vmem:[#allocation2 + $0x2c8] sm:$0xff]  ;;  %618 = vst [vmem:[#allocation5 + $0x298] sm:$0xff] %v763_v46  ;;  %v764_v49 = vsel %vm235_vm4, 1.0, %v865_v6  ;;  %v765_v50 = vsel %vm236_vm5, 1.0, %v865_v6  ;;  %v766_v51 = vsel %vm237_vm6, 1.0, %v865_v6  ;;  %vm238_vm7 = vcmp.gt.f32.partialorder %v110_v45, 0.0 }
  0x4e   :  { %v113_v52 = vld [vmem:[#allocation2 + $0x2d0] sm:$0xff]  ;;  %v114_v53 = vld [vmem:[#allocation2 + $0x2d8] sm:$0xff]  ;;  %619 = vst [vmem:[#allocation5 + $0x2a0] sm:$0xff] %v764_v49  ;;  %620 = vst [vmem:[#allocation5 + $0x2a8] sm:$0xff] %v765_v50  ;;  %v767_v54 = vsel %vm238_vm7, 1.0, %v865_v6  ;;  %vm239_vm8 = vcmp.gt.f32.partialorder %v111_v47, 0.0 }
  0x4f   :  { %621 = vst [vmem:[#allocation5 + $0x2b0] sm:$0xff] %v766_v51  ;;  %vm240_vm9 = vcmp.gt.f32.partialorder %v112_v48, 0.0  ;;  %vm241_vm10 = vcmp.gt.f32.partialorder %v113_v52, 0.0  ;;  %v115_v55 = vld [vmem:[#allocation2 + $0x2e0] sm:$0xff]  ;;  %v116_v56 = vld [vmem:[#allocation2 + $0x2e8] sm:$0xff]  ;;  %622 = vst [vmem:[#allocation5 + $0x2b8] sm:$0xff] %v767_v54 }
  0x50   :  { %v768_v57 = vsel %vm239_vm8, 1.0, %v865_v6  ;;  %v769_v58 = vsel %vm240_vm9, 1.0, %v865_v6  ;;  %v770_v59 = vsel %vm241_vm10, 1.0, %v865_v6  ;;  %vm242_vm11 = vcmp.gt.f32.partialorder %v114_v53, 0.0  ;;  %v117_v60 = vld [vmem:[#allocation2 + $0x2f0] sm:$0xff]  ;;  %v118_v61 = vld [vmem:[#allocation2 + $0x2f8] sm:$0xff] }
  0x51   :  { %623 = vst [vmem:[#allocation5 + $0x2c0] sm:$0xff] %v768_v57  ;;  %624 = vst [vmem:[#allocation5 + $0x2c8] sm:$0xff] %v769_v58  ;;  %v771_v62 = vsel %vm242_vm11, 1.0, %v865_v6  ;;  %vm243_vm12 = vcmp.gt.f32.partialorder %v115_v55, 0.0  ;;  %vm244_vm13 = vcmp.gt.f32.partialorder %v116_v56, 0.0  ;;  %vm245_vm14 = vcmp.gt.f32.partialorder %v117_v60, 0.0 }
  0x52   :  { %625 = vst [vmem:[#allocation5 + $0x2d0] sm:$0xff] %v770_v59  ;;  %v119_v63 = vld [vmem:[#allocation2 + $0x300] sm:$0xff]  ;;  %v120_v0 = vld [vmem:[#allocation2 + $0x308] sm:$0xff]  ;;  %626 = vst [vmem:[#allocation5 + $0x2d8] sm:$0xff] %v771_v62  ;;  %v772_v1 = vsel %vm243_vm12, 1.0, %v865_v6  ;;  %v773_v2 = vsel %vm244_vm13, 1.0, %v865_v6 }
  0x53   :  { %v774_v3 = vsel %vm245_vm14, 1.0, %v865_v6  ;;  %vm246_vm15 = vcmp.gt.f32.partialorder %v118_v61, 0.0  ;;  %v121_v4 = vld [vmem:[#allocation2 + $0x310] sm:$0xff]  ;;  %v122_v5 = vld [vmem:[#allocation2 + $0x318] sm:$0xff]  ;;  %627 = vst [vmem:[#allocation5 + $0x2e0] sm:$0xff] %v772_v1  ;;  %628 = vst [vmem:[#allocation5 + $0x2e8] sm:$0xff] %v773_v2 }
  0x54   :  { %629 = vst [vmem:[#allocation5 + $0x2f0] sm:$0xff] %v774_v3  ;;  %v775_v7 = vsel %vm246_vm15, 1.0, %v865_v6  ;;  %vm247_vm0 = vcmp.gt.f32.partialorder %v119_v63, 0.0  ;;  %vm248_vm1 = vcmp.gt.f32.partialorder %v120_v0, 0.0  ;;  %vm249_vm2 = vcmp.gt.f32.partialorder %v121_v4, 0.0  ;;  %v123_v8 = vld [vmem:[#allocation2 + $0x320] sm:$0xff] }
  0x55   :  { %v124_v9 = vld [vmem:[#allocation2 + $0x328] sm:$0xff]  ;;  %630 = vst [vmem:[#allocation5 + $0x2f8] sm:$0xff] %v775_v7  ;;  %v776_v10 = vsel %vm247_vm0, 1.0, %v865_v6  ;;  %v777_v11 = vsel %vm248_vm1, 1.0, %v865_v6  ;;  %v778_v12 = vsel %vm249_vm2, 1.0, %v865_v6  ;;  %vm250_vm3 = vcmp.gt.f32.partialorder %v122_v5, 0.0 }
  0x56   :  { %v125_v13 = vld [vmem:[#allocation2 + $0x330] sm:$0xff]  ;;  %v126_v14 = vld [vmem:[#allocation2 + $0x338] sm:$0xff]  ;;  %631 = vst [vmem:[#allocation5 + $0x300] sm:$0xff] %v776_v10  ;;  %632 = vst [vmem:[#allocation5 + $0x308] sm:$0xff] %v777_v11  ;;  %v779_v15 = vsel %vm250_vm3, 1.0, %v865_v6  ;;  %vm251_vm4 = vcmp.gt.f32.partialorder %v123_v8, 0.0 }
  0x57   :  { %633 = vst [vmem:[#allocation5 + $0x310] sm:$0xff] %v778_v12  ;;  %vm252_vm5 = vcmp.gt.f32.partialorder %v124_v9, 0.0  ;;  %vm253_vm6 = vcmp.gt.f32.partialorder %v125_v13, 0.0  ;;  %v127_v16 = vld [vmem:[#allocation2 + $0x340] sm:$0xff]  ;;  %v128_v17 = vld [vmem:[#allocation2 + $0x348] sm:$0xff]  ;;  %634 = vst [vmem:[#allocation5 + $0x318] sm:$0xff] %v779_v15 }
  0x58   :  { %v780_v18 = vsel %vm251_vm4, 1.0, %v865_v6  ;;  %v781_v19 = vsel %vm252_vm5, 1.0, %v865_v6  ;;  %v782_v20 = vsel %vm253_vm6, 1.0, %v865_v6  ;;  %vm254_vm7 = vcmp.gt.f32.partialorder %v126_v14, 0.0  ;;  %v129_v21 = vld [vmem:[#allocation2 + $0x350] sm:$0xff]  ;;  %v130_v22 = vld [vmem:[#allocation2 + $0x358] sm:$0xff] }
  0x59   :  { %635 = vst [vmem:[#allocation5 + $0x320] sm:$0xff] %v780_v18  ;;  %636 = vst [vmem:[#allocation5 + $0x328] sm:$0xff] %v781_v19  ;;  %v783_v23 = vsel %vm254_vm7, 1.0, %v865_v6  ;;  %vm255_vm8 = vcmp.gt.f32.partialorder %v127_v16, 0.0  ;;  %vm256_vm9 = vcmp.gt.f32.partialorder %v128_v17, 0.0  ;;  %vm257_vm10 = vcmp.gt.f32.partialorder %v129_v21, 0.0 }
  0x5a   :  { %637 = vst [vmem:[#allocation5 + $0x330] sm:$0xff] %v782_v20  ;;  %v131_v24 = vld [vmem:[#allocation2 + $0x360] sm:$0xff]  ;;  %v132_v25 = vld [vmem:[#allocation2 + $0x368] sm:$0xff]  ;;  %638 = vst [vmem:[#allocation5 + $0x338] sm:$0xff] %v783_v23  ;;  %v784_v26 = vsel %vm255_vm8, 1.0, %v865_v6  ;;  %v785_v27 = vsel %vm256_vm9, 1.0, %v865_v6 }
  0x5b   :  { %v786_v28 = vsel %vm257_vm10, 1.0, %v865_v6  ;;  %vm258_vm11 = vcmp.gt.f32.partialorder %v130_v22, 0.0  ;;  %v133_v29 = vld [vmem:[#allocation2 + $0x370] sm:$0xff]  ;;  %v134_v30 = vld [vmem:[#allocation2 + $0x378] sm:$0xff]  ;;  %639 = vst [vmem:[#allocation5 + $0x340] sm:$0xff] %v784_v26  ;;  %640 = vst [vmem:[#allocation5 + $0x348] sm:$0xff] %v785_v27 }
  0x5c   :  { %641 = vst [vmem:[#allocation5 + $0x350] sm:$0xff] %v786_v28  ;;  %v787_v31 = vsel %vm258_vm11, 1.0, %v865_v6  ;;  %vm259_vm12 = vcmp.gt.f32.partialorder %v131_v24, 0.0  ;;  %vm260_vm13 = vcmp.gt.f32.partialorder %v132_v25, 0.0  ;;  %vm261_vm14 = vcmp.gt.f32.partialorder %v133_v29, 0.0  ;;  %v135_v32 = vld [vmem:[#allocation2 + $0x380] sm:$0xff] }
  0x5d   :  { %v136_v33 = vld [vmem:[#allocation2 + $0x388] sm:$0xff]  ;;  %642 = vst [vmem:[#allocation5 + $0x358] sm:$0xff] %v787_v31  ;;  %v788_v34 = vsel %vm259_vm12, 1.0, %v865_v6  ;;  %v789_v35 = vsel %vm260_vm13, 1.0, %v865_v6  ;;  %v790_v36 = vsel %vm261_vm14, 1.0, %v865_v6  ;;  %vm262_vm15 = vcmp.gt.f32.partialorder %v134_v30, 0.0 }
  0x5e   :  { %v137_v37 = vld [vmem:[#allocation2 + $0x390] sm:$0xff]  ;;  %v138_v38 = vld [vmem:[#allocation2 + $0x398] sm:$0xff]  ;;  %643 = vst [vmem:[#allocation5 + $0x360] sm:$0xff] %v788_v34  ;;  %644 = vst [vmem:[#allocation5 + $0x368] sm:$0xff] %v789_v35  ;;  %v791_v39 = vsel %vm262_vm15, 1.0, %v865_v6  ;;  %vm263_vm0 = vcmp.gt.f32.partialorder %v135_v32, 0.0 }
  0x5f   :  { %645 = vst [vmem:[#allocation5 + $0x370] sm:$0xff] %v790_v36  ;;  %vm264_vm1 = vcmp.gt.f32.partialorder %v136_v33, 0.0  ;;  %vm265_vm2 = vcmp.gt.f32.partialorder %v137_v37, 0.0  ;;  %v139_v40 = vld [vmem:[#allocation2 + $0x3a0] sm:$0xff]  ;;  %v140_v41 = vld [vmem:[#allocation2 + $0x3a8] sm:$0xff]  ;;  %646 = vst [vmem:[#allocation5 + $0x378] sm:$0xff] %v791_v39 }
  0x60   :  { %v792_v42 = vsel %vm263_vm0, 1.0, %v865_v6  ;;  %v793_v43 = vsel %vm264_vm1, 1.0, %v865_v6  ;;  %v794_v44 = vsel %vm265_vm2, 1.0, %v865_v6  ;;  %vm266_vm3 = vcmp.gt.f32.partialorder %v138_v38, 0.0  ;;  %v141_v45 = vld [vmem:[#allocation2 + $0x3b0] sm:$0xff]  ;;  %v142_v46 = vld [vmem:[#allocation2 + $0x3b8] sm:$0xff] }
  0x61   :  { %647 = vst [vmem:[#allocation5 + $0x380] sm:$0xff] %v792_v42  ;;  %648 = vst [vmem:[#allocation5 + $0x388] sm:$0xff] %v793_v43  ;;  %v795_v47 = vsel %vm266_vm3, 1.0, %v865_v6  ;;  %vm267_vm4 = vcmp.gt.f32.partialorder %v139_v40, 0.0  ;;  %vm268_vm5 = vcmp.gt.f32.partialorder %v140_v41, 0.0  ;;  %vm269_vm6 = vcmp.gt.f32.partialorder %v141_v45, 0.0 }
  0x62   :  { %649 = vst [vmem:[#allocation5 + $0x390] sm:$0xff] %v794_v44  ;;  %v143_v48 = vld [vmem:[#allocation2 + $0x3c0] sm:$0xff]  ;;  %v144_v49 = vld [vmem:[#allocation2 + $0x3c8] sm:$0xff]  ;;  %650 = vst [vmem:[#allocation5 + $0x398] sm:$0xff] %v795_v47  ;;  %v796_v50 = vsel %vm267_vm4, 1.0, %v865_v6  ;;  %v797_v51 = vsel %vm268_vm5, 1.0, %v865_v6 }
  0x63   :  { %v798_v52 = vsel %vm269_vm6, 1.0, %v865_v6  ;;  %vm270_vm7 = vcmp.gt.f32.partialorder %v142_v46, 0.0  ;;  %v145_v53 = vld [vmem:[#allocation2 + $0x3d0] sm:$0xff]  ;;  %v146_v54 = vld [vmem:[#allocation2 + $0x3d8] sm:$0xff]  ;;  %651 = vst [vmem:[#allocation5 + $0x3a0] sm:$0xff] %v796_v50  ;;  %652 = vst [vmem:[#allocation5 + $0x3a8] sm:$0xff] %v797_v51 }
  0x64   :  { %653 = vst [vmem:[#allocation5 + $0x3b0] sm:$0xff] %v798_v52  ;;  %v799_v55 = vsel %vm270_vm7, 1.0, %v865_v6  ;;  %vm271_vm8 = vcmp.gt.f32.partialorder %v143_v48, 0.0  ;;  %vm272_vm9 = vcmp.gt.f32.partialorder %v144_v49, 0.0  ;;  %vm273_vm10 = vcmp.gt.f32.partialorder %v145_v53, 0.0  ;;  %v147_v56 = vld [vmem:[#allocation2 + $0x3e0] sm:$0xff] }
  0x65   :  { %v148_v57 = vld [vmem:[#allocation2 + $0x3e8] sm:$0xff]  ;;  %654 = vst [vmem:[#allocation5 + $0x3b8] sm:$0xff] %v799_v55  ;;  %v800_v58 = vsel %vm271_vm8, 1.0, %v865_v6  ;;  %v801_v59 = vsel %vm272_vm9, 1.0, %v865_v6  ;;  %v802_v60 = vsel %vm273_vm10, 1.0, %v865_v6  ;;  %vm274_vm11 = vcmp.gt.f32.partialorder %v146_v54, 0.0 }
  0x66   :  { %v149_v61 = vld [vmem:[#allocation2 + $0x3f0] sm:$0xff]  ;;  %v150_v62 = vld [vmem:[#allocation2 + $0x3f8] sm:$0xff]  ;;  %655 = vst [vmem:[#allocation5 + $0x3c0] sm:$0xff] %v800_v58  ;;  %656 = vst [vmem:[#allocation5 + $0x3c8] sm:$0xff] %v801_v59  ;;  %v803_v63 = vsel %vm274_vm11, 1.0, %v865_v6  ;;  %vm275_vm12 = vcmp.gt.f32.partialorder %v147_v56, 0.0 }
  0x67   :  { %657 = vst [vmem:[#allocation5 + $0x3d0] sm:$0xff] %v802_v60  ;;  %vm276_vm13 = vcmp.gt.f32.partialorder %v148_v57, 0.0  ;;  %vm277_vm14 = vcmp.gt.f32.partialorder %v149_v61, 0.0  ;;  %658 = vst [vmem:[#allocation5 + $0x3d8] sm:$0xff] %v803_v63  ;;  %v804_v0 = vsel %vm275_vm12, 1.0, %v865_v6  ;;  %vm278_vm15 = vcmp.gt.f32.partialorder %v150_v62, 0.0 }
  0x68   :  { %v805_v1 = vsel %vm276_vm13, 1.0, %v865_v6  ;;  %v806_v2 = vsel %vm277_vm14, 1.0, %v865_v6  ;;  %659 = vst [vmem:[#allocation5 + $0x3e0] sm:$0xff] %v804_v0  ;;  %v807_v3 = vsel %vm278_vm15, 1.0, %v865_v6  ;;  %s835_s0 = scalar_lea.vmem %s669_s21, 16384 }
  0x69   :  { %660 = vst [vmem:[#allocation5 + $0x3e8] sm:$0xff] %v805_v1  ;;  %661 = vst [vmem:[#allocation5 + $0x3f0] sm:$0xff] %v806_v2  ;;  %p836_p8 = scmp.ne.s32.totalorder %s669_s21, %s835_s0  ;;  %p841_p10 = scmp.lt.s32.totalorder %s835_s0, %s835_s0 }
  0x6a   :  { %662 = vst [vmem:[#allocation5 + $0x3f8] sm:$0xff] %v807_v3 }
  0x6b   :  { %p842_p11 = por %p841_p10, %p840_p9 }
  0x6d   :  { %p843_p12 = pnand %p842_p11, %p836_p8 }
  0x6f   :  { %846 = shalt.err (!%p843_p12)
}
  0x70   :  { %s847_s24 = scalar_lea.hbm %s1038_s1, 16384 }
  0x71   :  { %p848_p13 = scmp.ne.s32.totalorder %s1038_s1, %s847_s24  ;;  %p851_p0 = scmp.lt.u32.totalorder %s847_s24, %s1038_s1 }
  0x73   :  { %p853_p1 = pnand %p851_p0, %p848_p13 }
  0x75   :  { %856 = shalt.err (!%p853_p1)
}
  0x76   :  { %674 = dma.vmem_to_hbm [thread:$0]  %s669_s21, 16384, %s1038_s1, [#allocation4], %s862_s16, %s862_s16, %s863_s17  }
  0x77   :  { %859 = dma.done.wait [#allocation4], 16384  }
  0x78   :  { %860 = vsyncadd [#allocation4], 4294950912 }
  0x79   :  { %678 = vsyncpa [#allocation3], 1 }
  0x7a   :  { %679 = vsyncpa [#allocation4], 1 }

</bundles_post_ra>
